<compile_context>
chip_gen: v7x
topology: tpu7x:2x2x1
jax: 0.10.0
libtpu: 0.0.40
codegen_flags: <defaults>
</compile_context>

<pallas_src>
import functools

import jax
import jax.numpy as jnp
from jax.experimental import pallas as pl
from jax.experimental.pallas import tpu as pltpu

_LANES = 128


def _feature_block_kernel(x_ref, shp_ref, w_ref, o_ref, *,
                          L, dilation, W, scale_type, eps):
    # x_ref  : VMEM (Q, tn)   selected-channel batch tile, batch on lanes
    # shp_ref: SMEM (L,)      shapelet values (scalar reads)
    # w_ref  : VMEM (W, 1)    precomputed positional weight, /L folded in
    # o_ref  : VMEM (1, tn)   output features (lane-dense stores)
    f32 = jnp.float32
    Q, tn = x_ref.shape
    inv_L = 1.0 / float(L)

    # Scalar-unit work, once per tile: shapelet values and their sums.
    shp = [shp_ref[l] for l in range(L)]
    sshp1 = 0.0
    sshp2 = 0.0
    for s in shp:
        sshp1 = sshp1 + s
        sshp2 = sshp2 + s * s

    w = w_ref[...].astype(f32)                                   # (W, 1)

    # Iterate compute over 128-lane sub-chunks so the (W, chunk) accumulators
    # stay register-resident while the DMA tile stays large.
    for c0 in range(0, tn, _LANES):
        cw = min(_LANES, tn - c0)
        xc = x_ref[:, c0:c0 + cw].astype(f32)                    # cast once

        def win(l):
            # l-th dilated position of every window: (W, cw) sublane slice.
            return xc[l * dilation:l * dilation + W, :]

        # Single streaming pass: raw sum, raw sum-of-squares, shapelet cross.
        ssr = jnp.zeros((W, cw), f32)        # sum_l x^2
        sxr = jnp.zeros((W, cw), f32)        # sum_l shp_l * x
        if scale_type in (1, 2):
            s1 = jnp.zeros((W, cw), f32)     # sum_l x
        for l in range(L):
            v = win(l)
            ssr = ssr + v * v
            sxr = sxr + shp[l] * v
            if scale_type in (1, 2):
                s1 = s1 + v

        if scale_type in (1, 2):
            mean = s1 * inv_L
            # Centered sum-of-squares; clamp >= 0 against cancellation -> NaN.
            ss = jnp.maximum(ssr - s1 * mean, 0.0)
            sxc = sxr - mean * sshp1
            if scale_type == 2:
                # torch.std default: unbiased (ddof=1); eps added to std.
                std = jnp.sqrt(ss * (1.0 / float(L - 1)))
                d = std + eps
                inv = pl.reciprocal(d, approx=True)              # EUP slot
                inv = inv * (2.0 - d * inv)                      # Newton step
                # sum_l (shp_l - c_l*inv)^2 = sshp2 - 2*inv*sxc + inv^2*ss
                dist = sshp2 + inv * (inv * ss - 2.0 * sxc)
            else:
                # sum_l (shp_l - c_l)^2
                dist = sshp2 - 2.0 * sxc + ss
        else:
            # No scaling: sum_l (shp_l - x_l)^2
            dist = sshp2 - 2.0 * sxr + ssr

        ftr = dist * w                                           # /L folded in
        agg = jnp.min(ftr, axis=0, keepdims=True)                # (1, cw)
        o_ref[:, c0:c0 + cw] = jnp.maximum(agg, 0.0)


def feature_block_forward(x, shapelet, pos_map, *, m, dilation, scale_type,
                          eps, pos_slope=1.0, block_n=512):
    """Pallas implementation of FeatureBlock.forward (value semantics).

    x        : (N, C, Q) time series, any float dtype.
    shapelet : (L,) parameter.
    pos_map  : (W,) parameter, W = Q - (L-1)*dilation.
    Returns  : (N, 1) float32 features.
    """
    N, C, Q = x.shape
    L = int(shapelet.shape[-1])
    W = Q - (L - 1) * dilation
    assert pos_map.shape[-1] == W
    assert 0 <= m < C
    if scale_type == 2:
        assert L >= 2, "unbiased std needs L >= 2 (same constraint as torch.std)"

    # One cheap mem-bound XLA pass: channel select + transpose to (Q, N).
    # Gives the kernel a contiguous slab per tile and a batch-on-lanes layout.
    xt = jnp.swapaxes(x[:, m, :], 0, 1)                          # (Q, N), native dtype

    # Tiny parameters, precomputed once on the host side of the call:
    shp = shapelet.reshape(L).astype(jnp.float32)
    neg = -pos_map.reshape(W).astype(jnp.float32)
    elu = jnp.where(neg > 0, neg, jnp.exp(neg) - 1.0)
    weight = ((pos_slope * elu + 2.0) / float(L)).reshape(W, 1)  # /L folded in

    # Batch tile: lane-aligned, and >=2 grid steps when N is large enough so
    # both v7x TensorCores get work (no-op on single-TC v5e/v6e).
    if N < 2 * _LANES:
        tn = N
    else:
        tn = min(int(block_n), N)
        tn = max(_LANES, (tn // _LANES) * _LANES)
        if tn >= N:
            half = (N + 1) // 2
            tn = pl.cdiv(half, _LANES) * _LANES
        tn = min(tn, N)
    grid = (pl.cdiv(N, tn),)

    kernel = functools.partial(
        _feature_block_kernel, L=L, dilation=dilation, W=W,
        scale_type=scale_type, eps=float(eps))

    out = pl.pallas_call(
        kernel,
        out_shape=jax.ShapeDtypeStruct((1, N), jnp.float32),
        grid=grid,
        in_specs=[
            pl.BlockSpec((Q, tn), lambda i: (0, i)),             # x tile
            pl.BlockSpec(memory_space=pltpu.MemorySpace.SMEM),   # shapelet
            pl.BlockSpec((W, 1), lambda i: (0, 0)),              # weight
        ],
        out_specs=pl.BlockSpec((1, tn), lambda i: (0, i)),
        compiler_params=pltpu.CompilerParams(
            dimension_semantics=("parallel",)),                  # megacore on v7x
    )(xt, shp, weight)
    return out.reshape(N, 1)


def feature_block_reference(x, shapelet, pos_map, *, m, dilation, scale_type,
                            eps, pos_slope=1.0):
    """Pure-JAX reference mirroring the PyTorch forward."""
    N, C, Q = x.shape
    L = shapelet.shape[-1]
    W = Q - (L - 1) * dilation
    xm = x[:, m, :].astype(jnp.float32)
    idx = jnp.arange(W)[:, None] + dilation * jnp.arange(L)[None, :]
    win = xm[:, idx]                                             # (N, W, L)
    if scale_type == 2:
        mean = win.mean(-1, keepdims=True)
        std = jnp.sqrt(jnp.sum((win - mean) ** 2, -1, keepdims=True) / (L - 1))
        win = (win - mean) / (std + eps)
    elif scale_type == 1:
        win = win - win.mean(-1, keepdims=True)
    shp = shapelet.reshape(1, 1, L).astype(jnp.float32)
    d = jnp.mean((shp - win) ** 2, axis=-1)                      # (N, W)
    neg = -pos_map.reshape(1, W).astype(jnp.float32)
    elu = jnp.where(neg > 0, neg, jnp.exp(neg) - 1.0)
    ftr = d * (pos_slope * elu + 2.0)
    return jnp.maximum(jnp.min(ftr, axis=-1), 0.0)[:, None]


def _check(N, C, Q, L, dilation, m, eps, scale_types, key):
    W = Q - (L - 1) * dilation
    kx, ks, kp = jax.random.split(key, 3)
    x = jax.random.normal(kx, (N, C, Q), dtype=jnp.float32)
    shapelet = jax.random.normal(ks, (L,), dtype=jnp.float32)
    pos_map = 0.1 * jax.random.normal(kp, (W,), dtype=jnp.float32)
    for scale_type in scale_types:
        out = feature_block_forward(x, shapelet, pos_map, m=m, dilation=dilation,
                                    scale_type=scale_type, eps=eps)
        out = jax.block_until_ready(out)
        ref = feature_block_reference(x, shapelet, pos_map, m=m, dilation=dilation,
                                      scale_type=scale_type, eps=eps)
        assert out.shape == (N, 1)
        # rtol 1e-4: single-pass variance reassociation + Newton-refined
        # approx reciprocal introduce ~1e-6 relative differences vs the
        # two-pass / exact-divide reference.
        assert jnp.allclose(out, ref, rtol=1e-4, atol=1e-5), (scale_type, out, ref)


if __name__ == "__main__":
    key = jax.random.PRNGKey(0)
    k1, k2 = jax.random.split(key)

    # Config 1: small, matches the module's typical single-tile shape.
    #   N=64, C=4, Q=64 (pDic['Q']), L=8, dilation=2, channel m=1, eps=1e-8.
    _check(N=64, C=4, Q=64, L=8, dilation=2, m=1, eps=1e-8,
           scale_types=(2, 1, 0), key=k1)

    # Config 2: exercises multi-tile grid (2 steps), multiple 128-lane compute
    # chunks and a partial trailing batch block.
    _check(N=320, C=3, Q=96, L=5, dilation=3, m=2, eps=1e-8,
           scale_types=(2,), key=k2)

    print("KERNEL_OK")
</pallas_src>

<mosaic_0001>
module attributes {stable_mosaic.version = 11 : i64} {
  func.func @_feature_block_kernel(%arg0: i32, %arg1: memref<64x64xf32, #tpu.memory_space<vmem>>, %arg2: memref<8xf32, #tpu.memory_space<smem>>, %arg3: memref<50x1xf32, #tpu.memory_space<vmem>>, %arg4: memref<1x64xf32, #tpu.memory_space<vmem>>) attributes {dimension_semantics = [#tpu.dimension_semantics<parallel>], iteration_bounds = array<i64: 1>, scalar_prefetch = 0 : i64, scratch_operands = 0 : i64, tpu.core_type = #tpu.core_type<tc>, window_params = [{transform_indices = @transform_0, window_bounds = array<i64: 64, 64>}, {transform_indices = @transform_1, window_bounds = array<i64: 8>}, {pipeline_mode = #tpu.pipeline_mode<synchronous>, transform_indices = @transform_2, window_bounds = array<i64: 50, 1>}, {transform_indices = @transform_3, window_bounds = array<i64: 1, 64>}]} {
    %c0 = arith.constant 0 : index
    %0 = memref.load %arg2[%c0] : memref<8xf32, #tpu.memory_space<smem>>
    %c1 = arith.constant 1 : index
    %1 = memref.load %arg2[%c1] : memref<8xf32, #tpu.memory_space<smem>>
    %c2 = arith.constant 2 : index
    %2 = memref.load %arg2[%c2] : memref<8xf32, #tpu.memory_space<smem>>
    %c3 = arith.constant 3 : index
    %3 = memref.load %arg2[%c3] : memref<8xf32, #tpu.memory_space<smem>>
    %c4 = arith.constant 4 : index
    %4 = memref.load %arg2[%c4] : memref<8xf32, #tpu.memory_space<smem>>
    %c5 = arith.constant 5 : index
    %5 = memref.load %arg2[%c5] : memref<8xf32, #tpu.memory_space<smem>>
    %c6 = arith.constant 6 : index
    %6 = memref.load %arg2[%c6] : memref<8xf32, #tpu.memory_space<smem>>
    %c7 = arith.constant 7 : index
    %7 = memref.load %arg2[%c7] : memref<8xf32, #tpu.memory_space<smem>>
    %cst = arith.constant 0.000000e+00 : f32
    %8 = arith.addf %cst, %0 : f32
    %9 = arith.mulf %0, %0 : f32
    %cst_0 = arith.constant 0.000000e+00 : f32
    %10 = arith.addf %cst_0, %9 : f32
    %11 = arith.addf %8, %1 : f32
    %12 = arith.mulf %1, %1 : f32
    %13 = arith.addf %10, %12 : f32
    %14 = arith.addf %11, %2 : f32
    %15 = arith.mulf %2, %2 : f32
    %16 = arith.addf %13, %15 : f32
    %17 = arith.addf %14, %3 : f32
    %18 = arith.mulf %3, %3 : f32
    %19 = arith.addf %16, %18 : f32
    %20 = arith.addf %17, %4 : f32
    %21 = arith.mulf %4, %4 : f32
    %22 = arith.addf %19, %21 : f32
    %23 = arith.addf %20, %5 : f32
    %24 = arith.mulf %5, %5 : f32
    %25 = arith.addf %22, %24 : f32
    %26 = arith.addf %23, %6 : f32
    %27 = arith.mulf %6, %6 : f32
    %28 = arith.addf %25, %27 : f32
    %29 = arith.addf %26, %7 : f32
    %30 = arith.mulf %7, %7 : f32
    %31 = arith.addf %28, %30 : f32
    %c0_1 = arith.constant 0 : index
    %c0_2 = arith.constant 0 : index
    %32 = vector.load %arg3[%c0_1, %c0_2] : memref<50x1xf32, #tpu.memory_space<vmem>>, vector<50x1xf32>
    %c0_3 = arith.constant 0 : index
    %c0_4 = arith.constant 0 : index
    %33 = vector.load %arg1[%c0_3, %c0_4] : memref<64x64xf32, #tpu.memory_space<vmem>>, vector<64x64xf32>
    %cst_5 = arith.constant 0.000000e+00 : f32
    %34 = vector.broadcast %cst_5 : f32 to vector<50x64xf32>
    %cst_6 = arith.constant 0.000000e+00 : f32
    %35 = vector.broadcast %cst_6 : f32 to vector<50x64xf32>
    %cst_7 = arith.constant 0.000000e+00 : f32
    %36 = vector.broadcast %cst_7 : f32 to vector<50x64xf32>
    %37 = vector.extract_strided_slice %33 {offsets = [0, 0], sizes = [50, 64], strides = [1, 1]} : vector<64x64xf32> to vector<50x64xf32>
    %38 = arith.mulf %37, %37 : vector<50x64xf32>
    %39 = arith.addf %34, %38 : vector<50x64xf32>
    %40 = vector.broadcast %0 : f32 to vector<50x64xf32>
    %41 = arith.mulf %40, %37 : vector<50x64xf32>
    %42 = arith.addf %35, %41 : vector<50x64xf32>
    %43 = arith.addf %36, %37 : vector<50x64xf32>
    %44 = vector.extract_strided_slice %33 {offsets = [2, 0], sizes = [50, 64], strides = [1, 1]} : vector<64x64xf32> to vector<50x64xf32>
    %45 = arith.mulf %44, %44 : vector<50x64xf32>
    %46 = arith.addf %39, %45 : vector<50x64xf32>
    %47 = vector.broadcast %1 : f32 to vector<50x64xf32>
    %48 = arith.mulf %47, %44 : vector<50x64xf32>
    %49 = arith.addf %42, %48 : vector<50x64xf32>
    %50 = arith.addf %43, %44 : vector<50x64xf32>
    %51 = vector.extract_strided_slice %33 {offsets = [4, 0], sizes = [50, 64], strides = [1, 1]} : vector<64x64xf32> to vector<50x64xf32>
    %52 = arith.mulf %51, %51 : vector<50x64xf32>
    %53 = arith.addf %46, %52 : vector<50x64xf32>
    %54 = vector.broadcast %2 : f32 to vector<50x64xf32>
    %55 = arith.mulf %54, %51 : vector<50x64xf32>
    %56 = arith.addf %49, %55 : vector<50x64xf32>
    %57 = arith.addf %50, %51 : vector<50x64xf32>
    %58 = vector.extract_strided_slice %33 {offsets = [6, 0], sizes = [50, 64], strides = [1, 1]} : vector<64x64xf32> to vector<50x64xf32>
    %59 = arith.mulf %58, %58 : vector<50x64xf32>
    %60 = arith.addf %53, %59 : vector<50x64xf32>
    %61 = vector.broadcast %3 : f32 to vector<50x64xf32>
    %62 = arith.mulf %61, %58 : vector<50x64xf32>
    %63 = arith.addf %56, %62 : vector<50x64xf32>
    %64 = arith.addf %57, %58 : vector<50x64xf32>
    %65 = vector.extract_strided_slice %33 {offsets = [8, 0], sizes = [50, 64], strides = [1, 1]} : vector<64x64xf32> to vector<50x64xf32>
    %66 = arith.mulf %65, %65 : vector<50x64xf32>
    %67 = arith.addf %60, %66 : vector<50x64xf32>
    %68 = vector.broadcast %4 : f32 to vector<50x64xf32>
    %69 = arith.mulf %68, %65 : vector<50x64xf32>
    %70 = arith.addf %63, %69 : vector<50x64xf32>
    %71 = arith.addf %64, %65 : vector<50x64xf32>
    %72 = vector.extract_strided_slice %33 {offsets = [10, 0], sizes = [50, 64], strides = [1, 1]} : vector<64x64xf32> to vector<50x64xf32>
    %73 = arith.mulf %72, %72 : vector<50x64xf32>
    %74 = arith.addf %67, %73 : vector<50x64xf32>
    %75 = vector.broadcast %5 : f32 to vector<50x64xf32>
    %76 = arith.mulf %75, %72 : vector<50x64xf32>
    %77 = arith.addf %70, %76 : vector<50x64xf32>
    %78 = arith.addf %71, %72 : vector<50x64xf32>
    %79 = vector.extract_strided_slice %33 {offsets = [12, 0], sizes = [50, 64], strides = [1, 1]} : vector<64x64xf32> to vector<50x64xf32>
    %80 = arith.mulf %79, %79 : vector<50x64xf32>
    %81 = arith.addf %74, %80 : vector<50x64xf32>
    %82 = vector.broadcast %6 : f32 to vector<50x64xf32>
    %83 = arith.mulf %82, %79 : vector<50x64xf32>
    %84 = arith.addf %77, %83 : vector<50x64xf32>
    %85 = arith.addf %78, %79 : vector<50x64xf32>
    %86 = vector.extract_strided_slice %33 {offsets = [14, 0], sizes = [50, 64], strides = [1, 1]} : vector<64x64xf32> to vector<50x64xf32>
    %87 = arith.mulf %86, %86 : vector<50x64xf32>
    %88 = arith.addf %81, %87 : vector<50x64xf32>
    %89 = vector.broadcast %7 : f32 to vector<50x64xf32>
    %90 = arith.mulf %89, %86 : vector<50x64xf32>
    %91 = arith.addf %84, %90 : vector<50x64xf32>
    %92 = arith.addf %85, %86 : vector<50x64xf32>
    %cst_8 = arith.constant 1.250000e-01 : f32
    %93 = vector.broadcast %cst_8 : f32 to vector<50x64xf32>
    %94 = arith.mulf %92, %93 : vector<50x64xf32>
    %95 = arith.mulf %92, %94 : vector<50x64xf32>
    %96 = arith.subf %88, %95 : vector<50x64xf32>
    %cst_9 = arith.constant 0.000000e+00 : f32
    %97 = vector.broadcast %cst_9 : f32 to vector<50x64xf32>
    %98 = arith.maximumf %96, %97 : vector<50x64xf32>
    %99 = vector.broadcast %29 : f32 to vector<50x64xf32>
    %100 = arith.mulf %94, %99 : vector<50x64xf32>
    %101 = arith.subf %91, %100 : vector<50x64xf32>
    %cst_10 = arith.constant 0.142857149 : f32
    %102 = vector.broadcast %cst_10 : f32 to vector<50x64xf32>
    %103 = arith.mulf %98, %102 : vector<50x64xf32>
    %104 = math.sqrt %103 : vector<50x64xf32>
    %cst_11 = arith.constant 9.99999993E-9 : f32
    %105 = vector.broadcast %cst_11 : f32 to vector<50x64xf32>
    %106 = arith.addf %104, %105 : vector<50x64xf32>
    %107 = tpu.reciprocal %106 {approx = true} : vector<50x64xf32> -> vector<50x64xf32>
    %108 = arith.mulf %106, %107 : vector<50x64xf32>
    %cst_12 = arith.constant 2.000000e+00 : f32
    %109 = vector.broadcast %cst_12 : f32 to vector<50x64xf32>
    %110 = arith.subf %109, %108 : vector<50x64xf32>
    %111 = arith.mulf %107, %110 : vector<50x64xf32>
    %112 = arith.mulf %111, %98 : vector<50x64xf32>
    %cst_13 = arith.constant 2.000000e+00 : f32
    %113 = vector.broadcast %cst_13 : f32 to vector<50x64xf32>
    %114 = arith.mulf %113, %101 : vector<50x64xf32>
    %115 = arith.subf %112, %114 : vector<50x64xf32>
    %116 = arith.mulf %111, %115 : vector<50x64xf32>
    %117 = vector.broadcast %31 : f32 to vector<50x64xf32>
    %118 = arith.addf %117, %116 : vector<50x64xf32>
    %119 = vector.broadcast %32 : vector<50x1xf32> to vector<50x64xf32>
    %120 = arith.mulf %118, %119 : vector<50x64xf32>
    %cst_14 = arith.constant dense<0x7F800000> : vector<64xf32>
    %121 = vector.multi_reduction <minimumf>, %120, %cst_14 [0] : vector<50x64xf32> to vector<64xf32>
    %122 = vector.shape_cast %121 : vector<64xf32> to vector<1x64xf32>
    %cst_15 = arith.constant 0.000000e+00 : f32
    %123 = vector.broadcast %cst_15 : f32 to vector<1x64xf32>
    %124 = arith.maximumf %122, %123 : vector<1x64xf32>
    %c0_16 = arith.constant 0 : index
    %c0_17 = arith.constant 0 : index
    %125 = vector.load %arg4[%c0_16, %c0_17] : memref<1x64xf32, #tpu.memory_space<vmem>>, vector<1x64xf32>
    tpu.vector_store %arg4[%c0_16, %c0_17], %124 {strides = array<i32>} : memref<1x64xf32, #tpu.memory_space<vmem>>, vector<1x64xf32>,
    return
  }
  func.func @transform_0(%arg0: i32) -> (i32, i32) {
    %c0_i32 = arith.constant 0 : i32
    %c0_i32_0 = arith.constant 0 : i32
    return %c0_i32, %arg0 : i32, i32
  }
  func.func @transform_1(%arg0: i32) -> i32 {
    %c0_i32 = arith.constant 0 : i32
    %c0_i32_0 = arith.constant 0 : i32
    return %c0_i32 : i32
  }
  func.func @transform_2(%arg0: i32) -> (i32, i32) {
    %c0_i32 = arith.constant 0 : i32
    %c0_i32_0 = arith.constant 0 : i32
    %c0_i32_1 = arith.constant 0 : i32
    return %c0_i32, %c0_i32_0 : i32, i32
  }
  func.func @transform_3(%arg0: i32) -> (i32, i32) {
    %c0_i32 = arith.constant 0 : i32
    %c0_i32_0 = arith.constant 0 : i32
    return %c0_i32, %arg0 : i32, i32
  }
}

</mosaic_0001>

<bundles_post_ra>
// kernel: tpu_custom_call.1
= control target key start
LH: loop header
LB: loop body
LE: loop exit
PB: predicated region body
PF: predicated region fallthrough
CT: control target
= control target key end

     0   :  { %8 = vsyncpa [#allocation3], 0  ;;  %s2076_s0 = inlined_call_operand.hbm [shape: f32[64,64], index: 0, kind: input, shape index: {}]   ;;  %s2077_s1 = inlined_call_operand.vmem [shape: f32[8], index: 1, kind: input, shape index: {}]   ;;  %s2078_s2 = inlined_call_operand.vmem [shape: f32[50,1], index: 2, kind: input, shape index: {}]   ;;  %s2079_s3 = inlined_call_operand.hbm [shape: f32[1,64], index: 3, kind: output, shape index: {}]  }
   0x1   :  { %9 = vsyncpa [#allocation5], 0 }
   0x2   :  { %10 = vsyncpa [#allocation4], 0  ;;  %s1011_s12 = smov [#allocation2]   ;;  %s29_s16 = sshll.u32 %s2077_s1, 4  ;;  %s30_s16 = int_to_ptr.vmem [resolvable:$true] %s29_s16 }
   0x3   :  { %s16_s13 = sshll.u32 %s1011_s12, 4  ;;  %s949_s19 = scalar_lea.hbm %s2076_s0, 1024  ;;  %s17_s13 = int_to_ptr.vmem [resolvable:$true] %s16_s13 }
   0x4   :  { %p950_p0 = scmp.ne.s32.totalorder %s2076_s0, %s949_s19  ;;  %p953_p1 = scmp.lt.u32.totalorder %s949_s19, %s2076_s0 }
   0x6   :  { %p955_p2 = pnand %p953_p1, %p950_p0 }
   0x8   :  { %958 = shalt.err (!%p955_p2)
}
   0x9   :  { %s959_s24 = scalar_lea.vmem %s17_s13, 1024  ;;  %p964_p4 = scmp.lt.s32.totalorder %s17_s13, %s17_s13 }
   0xa   :  { %p960_p3 = scmp.ne.s32.totalorder %s17_s13, %s959_s24  ;;  %p965_p5 = scmp.lt.s32.totalorder %s959_s24, %s959_s24 }
   0xc   :  { %p966_p6 = por %p965_p5, %p964_p4 }
   0xe   :  { %p967_p7 = pnand %p966_p6, %p960_p3 }
  0x10   :  { %970 = shalt.err (!%p967_p7)
}
  0x11   :  { %s1012_s1 = smov 128   ;;  %s1013_s25 = smov 8  }
  0x12   :  { %22 = dma.hbm_to_vmem [thread:$0]  %s2076_s0, 1024, %s17_s13, [#allocation3], %s1012_s1, %s1012_s1, %s1013_s25  }
  0x13   :  { %s971_s28 = scalar_lea.vmem %s30_s16, 16  ;;  %p976_p9 = scmp.lt.s32.totalorder %s30_s16, %s30_s16 }
  0x14   :  { %p972_p8 = scmp.ne.s32.totalorder %s30_s16, %s971_s28  ;;  %p977_p10 = scmp.lt.s32.totalorder %s971_s28, %s971_s28 }
  0x16   :  { %p978_p11 = por %p977_p10, %p976_p9 }
  0x18   :  { %p979_p12 = pnand %p978_p11, %p972_p8 }
  0x1a   :  { %982 = shalt.err (!%p979_p12)
}
  0x1b   :  { %s1014_s29 = smov [#allocation6]  }
  0x1c   :  { %32 = dma.vmem_to_smem %s30_s16, 16, %s1014_s29, [#allocation5]  }
  0x1d   :  { %1005 = dma.done.wait [#allocation3], 1024  }
  0x1e   :  { %1006 = vsyncadd [#allocation3], 4294966272 }
  0x1f   :  { %1007 = dma.done.wait [#allocation5], 16  }
  0x20   :  { %1008 = vsyncadd [#allocation5], 4294967280 }
  0x21   :  { %41 = sfence }
  0x22   :  { %v76_v0 = vld [vmem:[%s2078_s2 + $0x10] sm:$0xff]  ;;  %v74_v1 = vld [vmem:[%s2078_s2] sm:$0xff]  ;;  %v1015_v2 = vmov 0   ;;  %v75_v4 = vld [vmem:[%s2078_s2 + $0x8] sm:$0xff]  ;;  %vm132_vm0 = vcmask 1045504   ;;  %vm236_vm1 = vcmask 1043456  }
  0x23   :  { %920 = vset.pattern.permute.xlu1 %v1015_v2  ;;  %919 = vset.pattern.permute.xlu0 %v1015_v2  ;;  %v78_v3 = vld [vmem:[%s2078_s2 + $0x20] sm:$0xff]  ;;  %v1064_v5 = vld [vmem:[#allocation2 + $0x10] sm:$0xff]  ;;  %v1066_v6 = vld [vmem:[#allocation2 + $0x18] sm:$0xff]  ;;  %vm333_vm2 = vcmask 1041408   ;;  %s1172_s16 = sld [smem:[#allocation6 + $0x2]]  ;;  %s1190_s17 = sld [smem:[#allocation6]] }
  0x24   :  { %836 = vperm.xlu1 %920, %v76_v0   ;;  %826 = vperm.xlu0 %919, %v74_v1   ;;  %2128 = vst [vmem:[#allocation11_spill] sm:$0xff] %v1064_v5  ;;  %2129 = vst [vmem:[#allocation12_spill] sm:$0xff] %v1066_v6  ;;  %v80_v7 = vld [vmem:[%s2078_s2 + $0x30] sm:$0x3]  ;;  %v79_v8 = vld [vmem:[%s2078_s2 + $0x28] sm:$0xff]  ;;  %v212_v9 = vrot.slane %v1064_v5, 2  ;;  %v1081_v12 = vmul.f32 %v1064_v5, %v1064_v5  ;;  %v1085_v13 = vmul.f32 %v1066_v6, %v1066_v6 }
  0x25   :  { %v214_v10 = vrot.slane %v1066_v6, 2  ;;  %v77_v11 = vld [vmem:[%s2078_s2 + $0x18] sm:$0xff]  ;;  %v309_v15 = vrot.slane %v1064_v5, 4  ;;  %v311_v16 = vrot.slane %v1066_v6, 4  ;;  %v406_v21 = vrot.slane %v1064_v5, 6  ;;  %v1118_v28 = vld [vmem:[#allocation2 + $0x20] sm:$0xff] }
  0x26   :  { %v136_v17 = vrot.slane %v1081_v12, 2  ;;  %v138_v19 = vrot.slane %v1085_v13, 2  ;;  %v408_v22 = vrot.slane %v1066_v6, 6  ;;  %v240_v25 = vrot.slane %v1081_v12, 4  ;;  %2130 = vst [vmem:[#allocation13_spill] sm:$0xff] %v1118_v28  ;;  %v1133_v37 = vld [vmem:[#allocation2] sm:$0xff] }
  0x27   :  { %v1090_v14 = vsel %vm132_vm0, %v212_v9, %v214_v10  ;;  %v1101_v20 = vsel %vm236_vm1, %v309_v15, %v311_v16  ;;  %v242_v26 = vrot.slane %v1085_v13, 4  ;;  %v2091_v32 = vrot.slane %v1081_v12, 6  ;;  %v1135_v38 = vld [vmem:[#allocation2 + $0x8] sm:$0xff]  ;;  %s1153_s2 = sld [smem:[#allocation6 + $0x1]]  ;;  %s1197_s18 = sld [smem:[#allocation6 + $0x3]] }
  0x28   :  { %846 = vperm.xlu1 %920, %v78_v3   ;;  %831 = vperm.xlu0 %919, %v75_v4   ;;  %v231_v18 = vadd.f32 %v1090_v14, %v1064_v5  ;;  %v1109_v24 = vsel %vm132_vm0, %v136_v17, %v138_v19  ;;  %v1116_v27 = vsel %vm333_vm2, %v406_v21, %v408_v22  ;;  %v339_v33 = vrot.slane %v1085_v13, 6  ;;  %s1238_s19 = sld [smem:[#allocation6 + $0x4]]  ;;  %s1249_s20 = sld [smem:[#allocation6 + $0x5]] }
  0x29   :  { %v155_v29 = vadd.f32 %v1109_v24, %v1081_v12  ;;  %v1126_v31 = vsel %vm236_vm1, %v240_v25, %v242_v26  ;;  %v216_v34 = vrot.slane %v1118_v28, 2  ;;  %v1147_v41 = vmul.f32 %v1118_v28, %v1118_v28  ;;  %s1258_s21 = sld [smem:[#allocation6 + $0x6]]  ;;  %s1285_s23 = sld [smem:[#allocation6 + $0x7]] }
  0x2a   :  { %v328_v23 = vadd.f32 %v1101_v20, %v231_v18  ;;  %v1143_v40 = vsel %vm333_vm2, %v2091_v32, %v339_v33  ;;  %v313_v42 = vrot.slane %v1118_v28, 4  ;;  %v209_v43 = vrot.slane %v1133_v37, 2  ;;  %s51_s29 = smul.f32 %s1190_s17, %s1190_s17 }
  0x2b   :  { %v259_v35 = vadd.f32 %v1126_v31, %v155_v29  ;;  %v217_v39 = vsel %vm132_vm0, %v214_v10, %v216_v34  ;;  %v210_v44 = vrot.slane %v1135_v38, 2  ;;  %v1160_v48 = vmul.f32 %v1133_v37, %v1133_v37  ;;  %s57_s0 = smul.f32 %s1172_s16, %s1172_s16 }
  0x2c   :  { %856 = vperm.xlu1 %920, %v80_v7   ;;  %851 = vperm.xlu0 %919, %v79_v8   ;;  %v425_v30 = vadd.f32 %v1116_v27, %v328_v23  ;;  %v314_v47 = vsel %vm236_vm1, %v311_v16, %v313_v42  ;;  %v1164_v49 = vmul.f32 %v1135_v38, %v1135_v38  ;;  %v140_v51 = vrot.slane %v1147_v41, 2 }
  0x2d   :  { %v356_v45 = vadd.f32 %v1143_v40, %v259_v35  ;;  %v211_v50 = vsel %vm132_vm0, %v209_v43, %v210_v44  ;;  %v244_v52 = vrot.slane %v1147_v41, 4  ;;  %v2088_v53 = vrot.slane %v1118_v28, 6  ;;  %s53_s22 = sadd.f32 %s1153_s2, %s1190_s17  ;;  %s54_s30 = smul.f32 %s1153_s2, %s1153_s2 }
  0x2e   :  { %v455_v36 = vadd.f32 %v425_v30, %v1066_v6  ;;  %v306_v54 = vrot.slane %v1133_v37, 4  ;;  %v141_v55 = vsel %vm132_vm0, %v138_v19, %v140_v51  ;;  %v229_v58 = vadd.f32 %v211_v50, %v1133_v37  ;;  %s60_s6 = smul.f32 %s1197_s18, %s1197_s18 }
  0x2f   :  { %v433_v56 = vadd.f32 %v356_v45, %v1085_v13  ;;  %v411_v59 = vsel %vm333_vm2, %v408_v22, %v2088_v53  ;;  %v133_v60 = vrot.slane %v1160_v48, 2  ;;  %v134_v61 = vrot.slane %v1164_v49, 2  ;;  %s1291_s24 = sadd.f32 %s1172_s16, %s53_s22  ;;  %s63_s8 = smul.f32 %s1238_s19, %s1238_s19 }
  0x30   :  { %841 = vperm.xlu0 %919, %v77_v11   ;;  %v521_v46 = vadd.f32 %v455_v36, %v217_v39  ;;  %v307_v62 = vrot.slane %v1135_v38, 4  ;;  %v156_v63 = vadd.f32 %v141_v55, %v1085_v13  ;;  %v245_v0 = vsel %vm236_vm1, %v242_v26, %v244_v52  ;;  %s55_s4 = sadd.f32 %s54_s30, %s51_s29  ;;  %s66_s10 = smul.f32 %s1249_s20, %s1249_s20 }
  0x31   :  { %v403_v2 = vrot.slane %v1133_v37, 6  ;;  %v404_v3 = vrot.slane %v1135_v38, 6  ;;  %v467_v4 = vadd.f32 %v433_v56, %v141_v55  ;;  %v1200_v8 = vstv %s1153_s2  ;;  %s59_s1 = sadd.f32 %s1197_s18, %s1291_s24  ;;  %s69_s12 = smul.f32 %s1258_s21, %s1258_s21 }
  0x32   :  { %v585_v57 = vadd.f32 %v521_v46, %v314_v47  ;;  %v308_v1 = vsel %vm236_vm1, %v306_v54, %v307_v62  ;;  %v135_v11 = vsel %vm132_vm0, %v133_v60, %v134_v61  ;;  %v237_v13 = vrot.slane %v1160_v48, 4  ;;  %s58_s5 = sadd.f32 %s57_s0, %s55_s4  ;;  %s72_s14 = smul.f32 %s1285_s23, %s1285_s23 }
  0x33   :  { %v326_v10 = vadd.f32 %v308_v1, %v229_v58  ;;  %v238_v16 = vrot.slane %v1164_v49, 4  ;;  %v405_v18 = vsel %vm333_vm2, %v403_v2, %v404_v3  ;;  %v1212_v19 = vmul.f32 %v1200_v8, %v1064_v5  ;;  %s1387_s25 = sadd.f32 %s1238_s19, %s59_s1  ;;  %s1016_s2 = smov [#allocation7]  }
  0x34   :  { %v649_v7 = vadd.f32 %v585_v57, %v411_v59  ;;  %v1216_v22 = vmul.f32 %v1200_v8, %v1066_v6  ;;  %v232_v23 = vadd.f32 %v217_v39, %v1066_v6  ;;  %v260_v26 = vadd.f32 %v245_v0, %v156_v63  ;;  %s61_s7 = sadd.f32 %s60_s6, %s58_s5 }
  0x35   :  { %v2089_v29 = vrot.slane %v1147_v41, 6  ;;  %v1221_v30 = vstv %s1172_s16  ;;  %v532_v35 = vadd.f32 %v467_v4, %v245_v0  ;;  %v153_v43 = vadd.f32 %v135_v11, %v1160_v48  ;;  %s65_s26 = sadd.f32 %s1249_s20, %s1387_s25  ;;  %s896_s16 = sshll.u32 %s1016_s2, 4  ;;  %s897_s16 = int_to_ptr.vmem [resolvable:$true] %s896_s16 }
  0x36   :  { %2131 = vst [vmem:[#allocation14_spill] sm:$0xff] %v1216_v22  ;;  %v1225_v36 = vmul.f32 %v1221_v30, %v1064_v5  ;;  %v423_v45 = vadd.f32 %v405_v18, %v326_v10  ;;  %v1228_v46 = vmul.f32 0.125, %v649_v7  ;;  %v239_v39 = vsel %vm236_vm1, %v237_v13, %v238_v16  ;;  %s64_s9 = sadd.f32 %s63_s8, %s61_s7  ;;  %p988_p0 = scmp.lt.s32.totalorder %s897_s16, %s897_s16 }
  0x37   :  { %v334_v50 = vrot.slane %v1160_v48, 6  ;;  %v2090_v54 = vrot.slane %v1164_v49, 6  ;;  %v342_v55 = vsel %vm333_vm2, %v339_v33, %v2089_v29  ;;  %v2085_v56 = vrot.slane %v1212_v19, 2  ;;  %s1468_s27 = sadd.f32 %s1258_s21, %s65_s26 }
  0x38   :  { %2132 = vst [vmem:[#allocation15_spill] sm:$0xff] %v1225_v36  ;;  %v2081_v57 = vrot.slane %v1216_v22, 2  ;;  %v1244_v58 = vmul.f32 %v1221_v30, %v1066_v6  ;;  %v329_v60 = vadd.f32 %v314_v47, %v232_v23  ;;  %v357_v48 = vadd.f32 %v342_v55, %v260_v26  ;;  %s67_s11 = sadd.f32 %s66_s10, %s64_s9 }
  0x39   :  { %v1247_v63 = vstv %s1190_s17  ;;  %v1254_v0 = vstv %s1197_s18  ;;  %v257_v1 = vadd.f32 %v239_v39, %v153_v43  ;;  %v453_v2 = vadd.f32 %v423_v45, %v1135_v38  ;;  %s71_s28 = sadd.f32 %s1285_s23, %s1468_s27  ;;  %s983_s17 = scalar_lea.vmem %s897_s16, 16 }
  0x3a   :  { %2133 = vst [vmem:[#allocation16_spill] sm:$0xff] %v1244_v58  ;;  %v106_v33 = vmul.f32 %v1247_v63, %v1064_v5  ;;  %v596_v4 = vadd.f32 %v532_v35, %v342_v55  ;;  %v663_v10 = vmul.f32 %v1228_v46, %v649_v7  ;;  %v2084_v47 = vrot.slane %v1225_v36, 4  ;;  %v1293_v55 = vld [vmem:[#allocation2 + $0x28] sm:$0xff]  ;;  %s70_s13 = sadd.f32 %s69_s12, %s67_s11  ;;  %p984_p13 = scmp.ne.s32.totalorder %s897_s16, %s983_s17 }
  0x3b   :  { %v336_v11 = vsel %vm333_vm2, %v334_v50, %v2090_v54  ;;  %v181_v13 = vsel %vm132_vm0, %v2085_v56, %v2081_v57  ;;  %v2080_v18 = vrot.slane %v1244_v58, 4  ;;  %v1274_v7 = vmul.f32 %v1254_v0, %v1064_v5  ;;  %s987_s18 = scalar_lea.vmem %s897_s16, 32 }
  0x3c   :  { %v1278_v23 = vmul.f32 %v1254_v0, %v1066_v6  ;;  %v426_v26 = vadd.f32 %v411_v59, %v329_v60  ;;  %v213_v35 = vsel %vm132_vm0, %v210_v44, %v212_v9  ;;  %v354_v43 = vadd.f32 %v336_v11, %v257_v1  ;;  %s73_s15 = sadd.f32 %s72_s14, %s70_s13  ;;  %p989_p1 = scmp.lt.s32.totalorder %s987_s18, %s983_s17 }
  0x3d   :  { %2134 = vst [vmem:[#allocation17_spill] sm:$0xff] %v1274_v7  ;;  %v519_v45 = vadd.f32 %v453_v2, %v213_v35  ;;  %v1288_v39 = vadd.f32 %v357_v48, %v1147_v41  ;;  %v670_v50 = vsub.f32 %v596_v4, %v663_v10  ;;  %v197_v59 = vadd.f32 %v181_v13, %v106_v33 }
  0x3e   :  { %2135 = vst [vmem:[#allocation18_spill] sm:$0xff] %v1278_v23  ;;  %v285_v9 = vsel %vm236_vm1, %v2084_v47, %v2080_v18  ;;  %v2083_v44 = vrot.slane %v1274_v7, 6  ;;  %v2082_v60 = vrot.slane %v1278_v23, 6  ;;  %v1303_v48 = vstv %s1238_s19  ;;  %p990_p2 = por %p989_p1, %p988_p0 }
  0x3f   :  { %2136 = vst [vmem:[#allocation19_spill] sm:$0xff] %v1288_v39  ;;  %v1306_v1 = vadd.f32 %v426_v26, %v1118_v28  ;;  %v441_v33 = vmul.f32 %v1303_v48, %v1066_v6  ;;  %v1315_v2 = vsel %vm236_vm1, %v307_v62, %v309_v15  ;;  %v1319_v4 = vmul.f32 %v1293_v55, %v1293_v55 }
  0x40   :  { %v1322_v10 = vstv %s1249_s20  ;;  %v431_v11 = vadd.f32 %v354_v43, %v1164_v49  ;;  %v583_v13 = vadd.f32 %v519_v45, %v1315_v2  ;;  %v2087_v26 = vrot.slane %v1293_v55, 2  ;;  %p991_p3 = pnand %p990_p2, %p984_p13 }
  0x41   :  { %2137 = vst [vmem:[#allocation20_spill] sm:$0xff] %v1306_v1  ;;  %v1327_v18 = vmax.f32 %v670_v50, 0.0  ;;  %v301_v57 = vadd.f32 %v285_v9, %v197_v59  ;;  %v1332_v15 = vstv %s1258_s21  ;;  %v2086_v62 = vrot.slane %v1319_v4, 2 }
  0x42   :  { %v382_v43 = vsel %vm333_vm2, %v2083_v44, %v2082_v60  ;;  %v1342_v45 = vmul.f32 %v1322_v10, %v1066_v6  ;;  %v1346_v50 = vmul.f32 %v1322_v10, %v1118_v28  ;;  %v1353_v59 = vsel %vm132_vm0, %v216_v34, %v2087_v26 }
  0x43   :  { %2138 = vst [vmem:[#allocation21_spill] sm:$0xff] %v1327_v18  ;;  %2141 = vst [vmem:[#allocation24_spill] sm:$0xff] %v1353_v59  ;;  %v137_v9 = vsel %vm132_vm0, %v134_v61, %v136_v17  ;;  %v1365_v60 = vsel %vm333_vm2, %v404_v3, %v406_v21  ;;  %v1372_v34 = vsel %vm132_vm0, %v140_v51, %v2086_v62  ;;  %v2093_v44 = vrot.slane %v1319_v4, 4 }
  0x44   :  { %2139 = vst [vmem:[#allocation22_spill] sm:$0xff] %v1342_v45  ;;  %2140 = vst [vmem:[#allocation23_spill] sm:$0xff] %v1346_v50  ;;  %v1377_v47 = vmul.f32 %v1332_v15, %v1066_v6  ;;  %v1380_v17 = vstv %s1285_s23  ;;  %v465_v61 = vadd.f32 %v431_v11, %v137_v9  ;;  %v647_v56 = vadd.f32 %v583_v13, %v1365_v60 }
  0x45   :  { %2142 = vst [vmem:[#allocation25_spill] sm:$0xff] %v1372_v34  ;;  %v1384_v21 = vmul.f32 0.14285715, %v1327_v18  ;;  %v1391_v51 = vmul.f32 %v1332_v15, %v1118_v28  ;;  %v233_v3 = vadd.f32 %v1353_v59, %v1118_v28  ;;  %v315_v62 = vrot.slane %v1293_v55, 4 }
  0x46   :  { %2143 = vst [vmem:[#allocation26_spill] sm:$0xff] %v1377_v47  ;;  %v398_v26 = vadd.f32 %v382_v43, %v301_v57  ;;  %v1399_v13 = vmul.f32 %v1380_v17, %v1066_v6  ;;  %v157_v53 = vadd.f32 %v1372_v34, %v1147_v41  ;;  %v1406_v54 = vmul.f32 %v1380_v17, %v1118_v28 }
  0x47   :  { %2144 = vst [vmem:[#allocation27_spill] sm:$0xff] %v1391_v51  ;;  %v241_v57 = vsel %vm236_vm1, %v238_v16, %v240_v25  ;;  %v1418_v43 = vsel %vm236_vm1, %v244_v52, %v2093_v44  ;;  %v1420_v32 = vmul.f32 0.125, %v647_v56  ;;  %v1425_v29 = vsel %vm236_vm1, %v313_v42, %v315_v62  ;;  %v1433_v52 = vld [vmem:[#allocation2 + $0x30] sm:$0xff] }
  0x48   :  { %2145 = vst [vmem:[#allocation28_spill] sm:$0xff] %v1399_v13  ;;  %2146 = vst [vmem:[#allocation29_spill] sm:$0xff] %v1406_v54  ;;  %v530_v11 = vadd.f32 %v465_v61, %v241_v57  ;;  %921 = vrsqrt.f32 %v1384_v21  ;;  %v330_v61 = vadd.f32 %v1425_v29, %v233_v3  ;;  %v154_v44 = vadd.f32 %v137_v9, %v1164_v49 }
  0x49   :  { %2147 = vst [vmem:[#allocation30_spill] sm:$0xff] %v1418_v43  ;;  %2148 = vst [vmem:[#allocation31_spill] sm:$0xff] %v1425_v29  ;;  %v230_v23 = vadd.f32 %v213_v35, %v1135_v38  ;;  %v261_v42 = vadd.f32 %v1418_v43, %v157_v53  ;;  %v412_v18 = vrot.slane %v1293_v55, 6  ;;  %v2149_v58 = vrot.slane %v1081_v12, 6 }
  0x4a   :  { %v2150_v22 = vrot.slane %v1164_v49, 6  ;;  %v161_v16 = vmul.f32 %v1200_v8, %v1133_v37  ;;  %v1449_v3 = vmul.f32 %v1200_v8, %v1135_v38  ;;  %v2152_v9 = vrot.slane %v1319_v4, 6 }
  0x4b   :  { %v2153_v35 = vrot.slane %v1147_v41, 6  ;;  %v661_v43 = vmul.f32 %v1420_v32, %v647_v56  ;;  %v1460_v49 = vrot.slane %v1433_v52, 2  ;;  %v448_v7 = vadd.f32 %v441_v33, %v398_v26 }
  0x4c   :  { %v338_v25 = vsel %vm333_vm2, %v2150_v22, %v2149_v58  ;;  %2151 = vst [vmem:[#allocation32_spill] sm:$0xff] %v1449_v3  ;;  %v2155_v22 = vrot.slane %v1118_v28, 6  ;;  %v1478_v29 = vrot.slane %v1433_v52, 4  ;;  %v2157_v33 = vrot.slane %v1346_v50, 2 }
  0x4d   :  { %v1456_v53 = vsel %vm333_vm2, %v2153_v35, %v2152_v9  ;;  %v594_v6 = vadd.f32 %v530_v11, %v338_v25  ;;  %v1473_v11 = vmul.f32 %v1433_v52, %v1433_v52  ;;  %v258_v9 = vadd.f32 %v241_v57, %v154_v44 }
  0x4e   :  { %2154 = vst [vmem:[#allocation33_spill] sm:$0xff] %v1456_v53  ;;  %v1465_v58 = vsel %vm333_vm2, %v2155_v22, %v412_v18  ;;  %v327_v35 = vadd.f32 %v1315_v2, %v230_v23  ;;  %v358_v22 = vadd.f32 %v1456_v53, %v261_v42  ;;  %v2158_v26 = vrot.slane %v1342_v45, 2 }
  0x4f   :  { %2156 = vst [vmem:[#allocation34_spill] sm:$0xff] %v1465_v58  ;;  %v427_v56 = vadd.f32 %v1465_v58, %v330_v61  ;;  %v175_v36 = vrot.slane %v161_v16, 2  ;;  %v265_v1 = vmul.f32 %v1221_v30, %v1133_v37  ;;  %v668_v44 = vsub.f32 %v594_v6, %v661_v43 }
  0x50   :  { %v493_v41 = vsel %vm132_vm0, %v2158_v26, %v2157_v33  ;;  %v1492_v2 = vmul.f32 %v1221_v30, %v1135_v38  ;;  %v2159_v57 = vrot.slane %v1293_v55, 2  ;;  %v1504_v33 = vrot.slane %v1473_v11, 2 }
  0x51   :  { %v457_v61 = vadd.f32 %v427_v56, %v1293_v55  ;;  %v1507_v6 = vrot.slane %v1433_v52, 6  ;;  %v355_v56 = vadd.f32 %v338_v25, %v258_v9  ;;  %v424_v26 = vadd.f32 %v1365_v60, %v327_v35 }
  0x52   :  { %v1498_v42 = vsel %vm132_vm0, %v2159_v57, %v1460_v49  ;;  %v1513_v23 = vsel %vm236_vm1, %v315_v62, %v1478_v29  ;;  %v435_v57 = vadd.f32 %v358_v22, %v1319_v4  ;;  %v922_v50 = vpop.eup %921  ;;  %v104_v16 = vmul.f32 %v1247_v63, %v1133_v37 }
  0x53   :  { %v523_v43 = vadd.f32 %v457_v61, %v1498_v42  ;;  %v279_v45 = vrot.slane %v265_v1, 4  ;;  %v362_v53 = vmul.f32 %v1254_v0, %v1133_v37  ;;  %v1521_v61 = vmax.f32 %v668_v44, 0.0 }
  0x54   :  { %v2161_v60 = vrot.slane %v1449_v3, 2  ;;  %v1529_v9 = vmul.f32 %v1254_v0, %v1135_v38  ;;  %v1531_v35 = vstv %s71_s28  ;;  %v2162_v1 = vrot.slane %v1319_v4, 2 }
  0x55   :  { %v587_v58 = vadd.f32 %v523_v43, %v1513_v23  ;;  %2160 = vst [vmem:[#allocation35_spill] sm:$0xff] %v1521_v61  ;;  %v1538_v22 = vrot.slane %v1473_v11, 4  ;;  %v1542_v44 = vsel %vm333_vm2, %v412_v18, %v1507_v6  ;;  %v2164_v43 = vrot.slane %v1377_v47, 4 }
  0x56   :  { %v177_v25 = vsel %vm132_vm0, %v175_v36, %v2161_v60  ;;  %v145_v37 = vsel %vm132_vm0, %v2162_v1, %v1504_v33  ;;  %v2163_v36 = vrot.slane %v1391_v51, 4  ;;  %v432_v62 = vadd.f32 %v355_v56, %v1081_v12 }
  0x57   :  { %v469_v59 = vadd.f32 %v435_v57, %v145_v37  ;;  %v651_v39 = vadd.f32 %v587_v58, %v1542_v44  ;;  %v719_v1 = vmul.f32 %v922_v50, %v1384_v21  ;;  %vm720_vm3 = vcmp.eq.f32.partialorder %v1384_v21, inf }
  0x58   :  { %v558_v60 = vsel %vm236_vm1, %v2164_v43, %v2163_v36  ;;  %v454_v34 = vadd.f32 %v424_v26, %v1064_v5  ;;  %v195_v3 = vadd.f32 %v177_v25, %v104_v16  ;;  %v1555_v18 = vmul.f32 0.14285715, %v1521_v61 }
  0x59   :  { %v2165_v51 = vrot.slane %v1492_v2, 4  ;;  %v376_v36 = vrot.slane %v362_v53, 6  ;;  %v2111_v12 = vrot.slane %v1529_v9, 6  ;;  %vm722_vm4 = vcmp.eq.f32.partialorder %v1384_v21, 0.0 }
  0x5a   :  { %v509_v58 = vadd.f32 %v493_v41, %v448_v7  ;;  %v2166_v50 = vrot.slane %v1319_v4, 4  ;;  %v1567_v16 = vrot.slane %v1473_v11, 6  ;;  %v723_v26 = vand.u32 2147483648, %v1384_v21 }
  0x5b   :  { %v281_v47 = vsel %vm236_vm1, %v279_v45, %v2165_v51  ;;  %v1570_v25 = vmul.f32 0.125, %v651_v39  ;;  %v466_v45 = vadd.f32 %v432_v62, %v1109_v24  ;;  %v721_v51 = vsel %vm720_vm3, %v1384_v21, %v719_v1 }
  0x5c   :  { %v249_v56 = vsel %vm236_vm1, %v2166_v50, %v1538_v22  ;;  %v299_v53 = vadd.f32 %v281_v47, %v195_v3  ;;  %v473_v7 = vmul.f32 %v1322_v10, %v1135_v38  ;;  %v1578_v41 = vmul.f32 %v1322_v10, %v1064_v5 }
  0x5d   :  { %v534_v57 = vadd.f32 %v469_v59, %v249_v56  ;;  %2167 = vst [vmem:[#allocation36_spill] sm:$0xff] %v1570_v25  ;;  %923 = vrsqrt.f32 %v1555_v18  ;;  %v378_v59 = vsel %vm333_vm2, %v376_v36, %v2111_v12  ;;  %v1586_v43 = vmul.f32 %v1332_v15, %v1135_v38 }
  0x5e   :  { %2168 = vst [vmem:[#allocation37_spill] sm:$0xff] %v1578_v41  ;;  %v520_v24 = vadd.f32 %v454_v34, %v1090_v14  ;;  %v2169_v47 = vrot.slane %v1406_v54, 6  ;;  %v2170_v3 = vrot.slane %v1399_v13, 6  ;;  %v1598_v1 = vmul.f32 %v1531_v35, %v1228_v46 }
  0x5f   :  { %v1602_v36 = vmul.f32 %v1332_v15, %v1064_v5  ;;  %v2173_v50 = vrot.slane %v1319_v4, 6  ;;  %v665_v12 = vmul.f32 %v1570_v25, %v651_v39  ;;  %v531_v61 = vadd.f32 %v466_v45, %v1126_v31 }
  0x60   :  { %v1594_v62 = vsel %vm333_vm2, %v2170_v3, %v2169_v47  ;;  %2171 = vst [vmem:[#allocation38_spill] sm:$0xff] %v1598_v1  ;;  %v584_v47 = vadd.f32 %v520_v24, %v1101_v20  ;;  %v1613_v46 = vsel %vm722_vm4, %v723_v26, %v721_v51  ;;  %v1615_v3 = vadd.f32 %v558_v60, %v509_v58 }
  0x61   :  { %2172 = vst [vmem:[#allocation39_spill] sm:$0xff] %v1602_v36  ;;  %v346_v14 = vsel %vm333_vm2, %v2173_v50, %v1567_v16  ;;  %v396_v54 = vadd.f32 %v378_v59, %v299_v53  ;;  %v439_v1 = vmul.f32 %v1303_v48, %v1135_v38  ;;  %v487_v13 = vrot.slane %v473_v7, 2 }
  0x62   :  { %v598_v34 = vadd.f32 %v534_v57, %v346_v14  ;;  %v2115_v50 = vrot.slane %v1578_v41, 2  ;;  %v648_v39 = vadd.f32 %v584_v47, %v1116_v27  ;;  %v1625_v20 = vmul.f32 %v1380_v17, %v1135_v38  ;;  %v1637_v27 = vld [vmem:[#allocation2 + $0x38] sm:$0xff] }
  0x63   :  { %v1629_v21 = vmul.f32 %v1380_v17, %v1064_v5  ;;  %v158_v60 = vadd.f32 %v145_v37, %v1319_v4  ;;  %v234_v58 = vadd.f32 %v1498_v42, %v1293_v55  ;;  %v595_v45 = vadd.f32 %v531_v61, %v1143_v40  ;;  %2175 = vst [vmem:[#allocation41_spill] sm:$0xff] %v1637_v27 }
  0x64   :  { %v672_v26 = vsub.f32 %v598_v34, %v665_v12  ;;  %v1635_v51 = vmul.f32 0.125, %v648_v39  ;;  %v446_v53 = vadd.f32 %v439_v1, %v396_v54  ;;  %v159_v7 = vadd.f32 %v1504_v33, %v1473_v11 }
  0x65   :  { %v235_v59 = vadd.f32 %v1460_v49, %v1433_v52  ;;  %v1645_v4 = vmul.f32 %v1637_v27, %v1637_v27  ;;  %v489_v42 = vsel %vm132_vm0, %v487_v13, %v2115_v50  ;;  %v1652_v40 = vmul.f32 %v1200_v8, %v1118_v28 }
  0x66   :  { %2174 = vst [vmem:[#allocation40_spill] sm:$0xff] %v1635_v51  ;;  %v1656_v54 = vmul.f32 %v1200_v8, %v1293_v55  ;;  %v662_v61 = vmul.f32 %v1635_v51, %v648_v39  ;;  %vm706_vm5 = vcmp.eq.f32.partialorder %v1555_v18, inf  ;;  %v709_v37 = vand.u32 2147483648, %v1555_v18 }
  0x67   :  { %2176 = vst [vmem:[#allocation42_spill] sm:$0xff] %v1652_v40  ;;  %v263_v12 = vadd.f32 %v1538_v22, %v159_v7  ;;  %v332_v24 = vadd.f32 %v1478_v29, %v235_v59  ;;  %v924_v1 = vpop.eup %923  ;;  %vm708_vm6 = vcmp.eq.f32.partialorder %v1555_v18, 0.0  ;;  %v262_v13 = vadd.f32 %v249_v56, %v158_v60 }
  0x68   :  { %v331_v34 = vadd.f32 %v1513_v23, %v234_v58  ;;  %v1665_v47 = vmax.f32 %v672_v26, 0.0  ;;  %v669_v50 = vsub.f32 %v595_v45, %v662_v61  ;;  %v461_v31 = vrot.slane %v1645_v4, 2 }
  0x69   :  { %v360_v57 = vadd.f32 %v1567_v16, %v263_v12  ;;  %v429_v39 = vadd.f32 %v1507_v6, %v332_v24  ;;  %v515_v51 = vrot.slane %v1637_v27, 2  ;;  %v1675_v56 = vmul.f32 %v1221_v30, %v1118_v28 }
  0x6a   :  { %2177 = vst [vmem:[#allocation43_spill] sm:$0xff] %v1665_v47  ;;  %v1677_v23 = vmax.f32 %v669_v50, 0.0  ;;  %v705_v60 = vmul.f32 %v924_v1, %v1555_v18  ;;  %v1682_v58 = vmul.f32 %v1221_v30, %v1293_v55  ;;  %v359_v61 = vadd.f32 %v346_v14, %v262_v13 }
  0x6b   :  { %v437_v26 = vadd.f32 %v1645_v4, %v360_v57  ;;  %v459_v45 = vadd.f32 %v429_v39, %v1637_v27  ;;  %v1687_v12 = vmul.f32 0.14285715, %v1665_v47  ;;  %v526_v24 = vrot.slane %v1645_v4, 4 }
  0x6c   :  { %2178 = vst [vmem:[#allocation44_spill] sm:$0xff] %v1677_v23  ;;  %v579_v7 = vrot.slane %v1637_v27, 4  ;;  %v108_v50 = vmul.f32 %v1247_v63, %v1118_v28  ;;  %v1694_v1 = vmul.f32 0.14285715, %v1677_v23  ;;  %v428_v57 = vadd.f32 %v1542_v44, %v331_v34 }
  0x6d   :  { %v471_v59 = vadd.f32 %v461_v31, %v437_v26  ;;  %v525_v25 = vadd.f32 %v515_v51, %v459_v45  ;;  %v2179_v39 = vrot.slane %v1656_v54, 2  ;;  %v2180_v14 = vrot.slane %v1652_v40, 2 }
  0x6e   :  { %v643_v41 = vrot.slane %v1637_v27, 6  ;;  %v707_v5 = vsel %vm706_vm5, %v1555_v18, %v705_v60  ;;  %v1710_v26 = vmul.f32 %v1254_v0, %v1118_v28  ;;  %v1714_v44 = vmul.f32 %v1254_v0, %v1293_v55 }
  0x6f   :  { %v185_v13 = vsel %vm132_vm0, %v2180_v14, %v2179_v39  ;;  %925 = vrsqrt.f32 %v1687_v12  ;;  %v536_v34 = vadd.f32 %v526_v24, %v471_v59  ;;  %v589_v45 = vadd.f32 %v579_v7, %v525_v25 }
  0x70   :  { %v590_v39 = vrot.slane %v1645_v4, 6  ;;  %v1719_v14 = vadd.f32 1e-08, %v1613_v46  ;;  %v2181_v60 = vrot.slane %v1602_v36, 4  ;;  %v2182_v47 = vrot.slane %v1586_v43, 4 }
  0x71   :  { %v616_v28 = vrot.slane %v1625_v20, 6  ;;  %927 = vrsqrt.f32 %v1694_v1  ;;  %v507_v40 = vadd.f32 %v489_v42, %v446_v53  ;;  %v436_v25 = vadd.f32 %v359_v61, %v1473_v11 }
  0x72   :  { %v554_v23 = vsel %vm236_vm1, %v2182_v47, %v2181_v60  ;;  %v653_v59 = vadd.f32 %v643_v41, %v589_v45  ;;  %v710_v46 = vsel %vm708_vm6, %v709_v37, %v707_v5  ;;  %v458_v4 = vadd.f32 %v428_v57, %v1433_v52 }
  0x73   :  { %v199_v36 = vadd.f32 %v185_v13, %v108_v50  ;;  %v2183_v43 = vrot.slane %v1682_v58, 4  ;;  %v2184_v47 = vrot.slane %v1675_v56, 4  ;;  %v2127_v60 = vrot.slane %v1710_v26, 6 }
  0x74   :  { %v385_v53 = vrot.slane %v1714_v44, 6  ;;  %v600_v42 = vadd.f32 %v590_v39, %v536_v34  ;;  %v1740_v27 = vmul.f32 0.125, %v653_v59  ;;  %929 = vrcp.f32 %v1719_v14 }
  0x75   :  { %v289_v20 = vsel %vm236_vm1, %v2184_v47, %v2183_v43  ;;  %v1745_v5 = vadd.f32 %v1594_v62, %v1615_v3  ;;  %v1749_v11 = vmul.f32 %v1531_v35, %v1420_v32  ;;  %v462_v18 = vsel %vm132_vm0, %v1504_v33, %v461_v31 }
  0x76   :  { %v1753_v37 = vadd.f32 1e-08, %v710_v46  ;;  %v572_v61 = vadd.f32 %v554_v23, %v507_v40  ;;  %v2185_v50 = vrot.slane %v1629_v21, 6  ;;  %v667_v13 = vmul.f32 %v1740_v27, %v653_v59 }
  0x77   :  { %v303_v34 = vadd.f32 %v289_v20, %v199_v36  ;;  %v470_v45 = vadd.f32 %v462_v18, %v436_v25  ;;  %v516_v62 = vsel %vm132_vm0, %v1460_v49, %v515_v51  ;;  %v580_v32 = vsel %vm236_vm1, %v1478_v29, %v579_v7 }
  0x78   :  { %v618_v57 = vsel %vm333_vm2, %v616_v28, %v2185_v50  ;;  %v386_v33 = vsel %vm333_vm2, %v2127_v60, %v385_v53  ;;  %v674_v3 = vsub.f32 %v600_v42, %v667_v13  ;;  %v524_v31 = vadd.f32 %v516_v62, %v458_v4 }
  0x79   :  { %v527_v28 = vsel %vm236_vm1, %v1538_v22, %v526_v24  ;;  %v1772_v36 = vmul.f32 %v1322_v10, %v1293_v55  ;;  %v1776_v49 = vmul.f32 %v1322_v10, %v1433_v52  ;;  %v1780_v29 = vmul.f32 %v1332_v15, %v1293_v55  ;;  %v926_v40 = vpop.eup %925 }
  0x7a   :  { %v644_v51 = vsel %vm333_vm2, %v1507_v6, %v643_v41  ;;  %v1784_v7 = vadd.f32 %v618_v57, %v572_v61  ;;  %v1788_v22 = vmul.f32 %v1303_v48, %v1293_v55  ;;  %v1790_v23 = vmax.f32 %v674_v3, 0.0 }
  0x7b   :  { %v588_v24 = vadd.f32 %v580_v32, %v524_v31  ;;  %v928_v25 = vpop.eup %927  ;;  %931 = vrcp.f32 %v1753_v37  ;;  %v1793_v59 = vadd.f32 %v386_v33, %v303_v34  ;;  %v1797_v46 = vmul.f32 %v1332_v15, %v1433_v52 }
  0x7c   :  { %v535_v6 = vadd.f32 %v527_v28, %v470_v45  ;;  %v1800_v41 = vmul.f32 0.14285715, %v1790_v23  ;;  %v167_v4 = vmul.f32 %v1200_v8, %v1433_v52  ;;  %v591_v43 = vsel %vm333_vm2, %v1567_v16, %v590_v39  ;;  %v2187_v39 = vld [vmem:[#allocation32_spill] sm:$0xff]  ;;  %v2189_v28 = vld [vmem:[#allocation25_spill] sm:$0xff] }
  0x7d   :  { %v652_v47 = vadd.f32 %v644_v51, %v588_v24  ;;  %v733_v20 = vmul.f32 %v926_v40, %v1687_v12  ;;  %v494_v42 = vrot.slane %v1772_v36, 2  ;;  %v496_v18 = vrot.slane %v1776_v49, 2  ;;  %v2190_v51 = vld [vmem:[#allocation19_spill] sm:$0xff]  ;;  %v2234_v36 = vld [vmem:[#allocation38_spill] sm:$0xff] }
  0x7e   :  { %v559_v61 = vrot.slane %v1780_v29, 4  ;;  %vm734_vm7 = vcmp.eq.f32.partialorder %v1687_v12, inf  ;;  %v712_v50 = vmul.f32 %v928_v25, %v1694_v1  ;;  %v105_v57 = vmul.f32 %v1247_v63, %v1135_v38  ;;  %v1815_v8 = vpop.eup %929 }
  0x7f   :  { %933 = vrsqrt.f32 %v1800_v41  ;;  %vm713_vm8 = vcmp.eq.f32.partialorder %v1694_v1, inf  ;;  %v2186_v16 = vrot.slane %v1212_v19, 2  ;;  %v2188_v13 = vrot.slane %v2187_v39, 2 }
  0x80   :  { %v599_v45 = vadd.f32 %v591_v43, %v535_v6  ;;  %v1823_v62 = vmul.f32 0.125, %v652_v47  ;;  %vm736_vm9 = vcmp.eq.f32.partialorder %v1687_v12, 0.0  ;;  %v737_v32 = vand.u32 2147483648, %v1687_v12  ;;  %v2191_v6 = vld [vmem:[#allocation24_spill] sm:$0xff] }
  0x81   :  { %v179_v34 = vsel %vm132_vm0, %v2188_v13, %v2186_v16  ;;  %v110_v38 = vmul.f32 %v1247_v63, %v1433_v52  ;;  %v186_v33 = vrot.slane %v167_v4, 2  ;;  %v735_v3 = vsel %vm734_vm7, %v1687_v12, %v733_v20  ;;  %v2192_v43 = vld [vmem:[#allocation20_spill] sm:$0xff] }
  0x82   :  { %v716_v31 = vand.u32 2147483648, %v1694_v1  ;;  %v666_v19 = vmul.f32 %v1823_v62, %v652_v47  ;;  %v468_v40 = vadd.f32 %v2190_v51, %v2189_v28  ;;  %v714_v24 = vsel %vm713_vm8, %v1694_v1, %v712_v50  ;;  %v2193_v28 = vld [vmem:[#allocation15_spill] sm:$0xff] }
  0x83   :  { %vm715_vm10 = vcmp.eq.f32.partialorder %v1694_v1, 0.0  ;;  %v271_v25 = vmul.f32 %v1221_v30, %v1433_v52  ;;  %v522_v16 = vadd.f32 %v2192_v43, %v2191_v6  ;;  %v561_v4 = vrot.slane %v1797_v46, 4  ;;  %v2197_v43 = vld [vmem:[#allocation31_spill] sm:$0xff] }
  0x84   :  { %v196_v20 = vadd.f32 %v179_v34, %v105_v57  ;;  %v673_v39 = vsub.f32 %v599_v45, %v666_v19  ;;  %v109_v47 = vmul.f32 %v1247_v63, %v1293_v55  ;;  %v738_v13 = vsel %vm736_vm9, %v737_v32, %v735_v3  ;;  %v2198_v45 = vld [vmem:[#allocation17_spill] sm:$0xff] }
  0x85   :  { %v2194_v50 = vrot.slane %v2193_v28, 4  ;;  %v2195_v1 = vrot.slane %v1492_v2, 4  ;;  %v2196_v30 = vrot.slane %v1656_v54, 2  ;;  %v586_v60 = vadd.f32 %v522_v16, %v2197_v43  ;;  %v1854_v57 = vpop.eup %931  ;;  %v2201_v2 = vld [vmem:[#allocation30_spill] sm:$0xff] }
  0x86   :  { %v717_v34 = vsel %vm715_vm10, %v716_v31, %v714_v24  ;;  %v2199_v19 = vrot.slane %v2198_v45, 6  ;;  %v2200_v12 = vrot.slane %v1529_v9, 6  ;;  %v1861_v3 = vmax.f32 %v673_v39, 0.0 }
  0x87   :  { %v283_v51 = vsel %vm236_vm1, %v2195_v1, %v2194_v50  ;;  %v187_v6 = vsel %vm132_vm0, %v2196_v30, %v186_v33  ;;  %v533_v28 = vadd.f32 %v468_v40, %v2201_v2  ;;  %v201_v50 = vadd.f32 %v186_v33, %v110_v38  ;;  %v2202_v30 = vld [vmem:[#allocation34_spill] sm:$0xff]  ;;  %v2205_v2 = vld [vmem:[#allocation11_spill] sm:$0xff] }
  0x88   :  { %v380_v32 = vsel %vm333_vm2, %v2200_v12, %v2199_v19  ;;  %v290_v1 = vrot.slane %v271_v25, 4  ;;  %v368_v54 = vmul.f32 %v1254_v0, %v1433_v52  ;;  %v650_v16 = vadd.f32 %v586_v60, %v2202_v30  ;;  %v2203_v60 = vld [vmem:[#allocation33_spill] sm:$0xff] }
  0x89   :  { %v1867_v43 = vadd.f32 1e-08, %v738_v13  ;;  %v300_v31 = vadd.f32 %v283_v51, %v196_v20  ;;  %v1870_v24 = vmul.f32 0.14285715, %v1861_v3  ;;  %v200_v9 = vadd.f32 %v187_v6, %v109_v47  ;;  %v934_v45 = vpop.eup %933 }
  0x8a   :  { %v1872_v19 = vadd.f32 1e-08, %v717_v34  ;;  %vm748_vm11 = vcmp.eq.f32.partialorder %v1800_v41, inf  ;;  %v751_v38 = vand.u32 2147483648, %v1800_v41  ;;  %v1876_v33 = vmul.f32 0.125, %v650_v16 }
  0x8b   :  { %v747_v0 = vmul.f32 %v934_v45, %v1800_v41  ;;  %vm750_vm12 = vcmp.eq.f32.partialorder %v1800_v41, 0.0  ;;  %935 = vrsqrt.f32 %v1870_v24  ;;  %v597_v40 = vadd.f32 %v533_v28, %v2203_v60  ;;  %v2210_v60 = vld [vmem:[#allocation14_spill] sm:$0xff] }
  0x8c   :  { %v1884_v25 = vmul.f32 %v1380_v17, %v1293_v55  ;;  %v305_v20 = vadd.f32 %v290_v1, %v201_v50  ;;  %v387_v39 = vrot.slane %v368_v54, 6  ;;  %v2204_v47 = vrot.slane %v1682_v58, 4  ;;  %v2206_v54 = vld [vmem:[#allocation41_spill] sm:$0xff] }
  0x8d   :  { %v450_v51 = vadd.f32 %v1788_v22, %v1793_v59  ;;  %v1893_v6 = vmul.f32 %v1380_v17, %v1433_v52  ;;  %v749_v34 = vsel %vm748_vm11, %v1800_v41, %v747_v0  ;;  %v664_v12 = vmul.f32 %v1876_v33, %v650_v16 }
  0x8e   :  { %v291_v13 = vsel %vm236_vm1, %v2204_v47, %v290_v1  ;;  %937 = vrcp.f32 %v1867_v43  ;;  %v397_v55 = vadd.f32 %v380_v32, %v300_v31  ;;  %v440_v58 = vmul.f32 %v1303_v48, %v2205_v2  ;;  %v2214_v47 = vld [vmem:[#allocation37_spill] sm:$0xff] }
  0x8f   :  { %v752_v28 = vsel %vm750_vm12, %v751_v38, %v749_v34  ;;  %939 = vrcp.f32 %v1872_v19  ;;  %v304_v59 = vadd.f32 %v291_v13, %v200_v9  ;;  %v671_v50 = vsub.f32 %v597_v40, %v664_v12  ;;  %v2207_v9 = vld [vmem:[#allocation12_spill] sm:$0xff]  ;;  %v2208_v38 = vld [vmem:[#allocation42_spill] sm:$0xff] }
  0x90   :  { %v1901_v22 = vadd.f32 1e-08, %v752_v28  ;;  %v402_v1 = vadd.f32 %v387_v39, %v305_v20  ;;  %v445_v41 = vmul.f32 %v1303_v48, %v2206_v54  ;;  %v479_v30 = vmul.f32 %v1322_v10, %v2206_v54 }
  0x91   :  { %v388_v32 = vsel %vm333_vm2, %v385_v53, %v387_v39  ;;  %v497_v16 = vsel %vm132_vm0, %v494_v42, %v496_v18  ;;  %v1918_v31 = vmax.f32 %v671_v50, 0.0  ;;  %v107_v45 = vmul.f32 %v1247_v63, %v2207_v9  ;;  %v2212_v39 = vld [vmem:[#allocation22_spill] sm:$0xff] }
  0x92   :  { %941 = vrcp.f32 %v1901_v22  ;;  %v562_v10 = vsel %vm236_vm1, %v559_v61, %v561_v4  ;;  %v623_v44 = vrot.slane %v1884_v25, 6  ;;  %v447_v53 = vadd.f32 %v440_v58, %v397_v55 }
  0x93   :  { %v2209_v0 = vrot.slane %v2208_v38, 2  ;;  %v2211_v40 = vrot.slane %v2210_v60, 2  ;;  %v2213_v63 = vrot.slane %v2212_v39, 2  ;;  %v2215_v13 = vrot.slane %v2214_v47, 2 }
  0x94   :  { %v401_v12 = vadd.f32 %v388_v32, %v304_v59  ;;  %v444_v2 = vmul.f32 %v1303_v48, %v1433_v52  ;;  %v1943_v28 = vmul.f32 0.14285715, %v1918_v31  ;;  %v511_v55 = vadd.f32 %v497_v16, %v450_v51  ;;  %v2219_v16 = vld [vmem:[#allocation26_spill] sm:$0xff] }
  0x95   :  { %v183_v20 = vsel %vm132_vm0, %v2211_v40, %v2209_v0  ;;  %v491_v34 = vsel %vm132_vm0, %v2215_v13, %v2213_v63  ;;  %v452_v58 = vadd.f32 %v445_v41, %v402_v1  ;;  %v498_v50 = vrot.slane %v479_v30, 2  ;;  %v936_v38 = vpop.eup %935  ;;  %v2217_v1 = vld [vmem:[#allocation16_spill] sm:$0xff] }
  0x96   :  { %v544_v9 = vmul.f32 %v1332_v15, %v2206_v54  ;;  %vm741_vm13 = vcmp.eq.f32.partialorder %v1870_v24, inf  ;;  %v744_v0 = vand.u32 2147483648, %v1870_v24  ;;  %943 = vrsqrt.f32 %v1943_v28 }
  0x97   :  { %v198_v59 = vadd.f32 %v183_v20, %v107_v45  ;;  %v508_v52 = vadd.f32 %v491_v34, %v447_v53  ;;  %v740_v32 = vmul.f32 %v936_v38, %v1870_v24  ;;  %vm743_vm14 = vcmp.eq.f32.partialorder %v1870_v24, 0.0  ;;  %v2221_v45 = vld [vmem:[#allocation39_spill] sm:$0xff]  ;;  %v2223_v38 = vld [vmem:[#allocation36_spill] sm:$0xff] }
  0x98   :  { %v2216_v51 = vrot.slane %v1675_v56, 4  ;;  %v2218_v15 = vrot.slane %v2217_v1, 4  ;;  %v625_v30 = vrot.slane %v1893_v6, 6  ;;  %v2220_v60 = vrot.slane %v2219_v16, 4  ;;  %v938_v63 = vpop.eup %937 }
  0x99   :  { %v2222_v40 = vrot.slane %v2221_v45, 4  ;;  %v608_v53 = vmul.f32 %v1380_v17, %v2206_v54  ;;  %v451_v39 = vadd.f32 %v444_v2, %v401_v12  ;;  %v1969_v56 = vmul.f32 %v1815_v8, %v1719_v14  ;;  %v940_v34 = vpop.eup %939 }
  0x9a   :  { %v287_v41 = vsel %vm236_vm1, %v2218_v15, %v2216_v51  ;;  %v563_v47 = vrot.slane %v544_v9, 4  ;;  %v742_v6 = vsel %vm741_vm13, %v1870_v24, %v740_v32  ;;  %v499_v13 = vsel %vm132_vm0, %v496_v18, %v498_v50  ;;  %v2225_v32 = vld [vmem:[#allocation18_spill] sm:$0xff] }
  0x9b   :  { %v556_v20 = vsel %vm236_vm1, %v2222_v40, %v2220_v60  ;;  %v1979_v51 = vmul.f32 %v1531_v35, %v2223_v38  ;;  %v513_v17 = vadd.f32 %v498_v50, %v452_v58  ;;  %v745_v54 = vsel %vm743_vm14, %v744_v0, %v742_v6  ;;  %v2227_v50 = vld [vmem:[#allocation28_spill] sm:$0xff]  ;;  %v2230_v40 = vld [vmem:[#allocation13_spill] sm:$0xff] }
  0x9c   :  { %v302_v12 = vadd.f32 %v287_v41, %v198_v59  ;;  %v576_v14 = vadd.f32 %v562_v10, %v511_v55  ;;  %v573_v2 = vadd.f32 %v556_v20, %v508_v52  ;;  %v758_v9 = vadd.f32 1e-08, %v745_v54  ;;  %v942_v1 = vpop.eup %941 }
  0x9d   :  { %v2224_v24 = vrot.slane %v1710_v26, 6  ;;  %v2226_v49 = vrot.slane %v2225_v32, 6  ;;  %v626_v58 = vsel %vm333_vm2, %v623_v44, %v625_v30  ;;  %v2228_v0 = vrot.slane %v2227_v50, 6 }
  0x9e   :  { %v2229_v59 = vrot.slane %v1629_v21, 6  ;;  %v627_v55 = vrot.slane %v608_v53, 6  ;;  %v512_v52 = vadd.f32 %v499_v13, %v451_v39  ;;  %v771_v26 = vmul.f32 %v938_v63, %v1867_v43  ;;  %v2231_v53 = vld [vmem:[#allocation40_spill] sm:$0xff] }
  0x9f   :  { %v384_v18 = vsel %vm333_vm2, %v2226_v49, %v2224_v24  ;;  %v768_v15 = vmul.f32 %v940_v34, %v1872_v19  ;;  %945 = vrcp.f32 %v758_v9  ;;  %v564_v41 = vsel %vm236_vm1, %v561_v4, %v563_v47 }
  0xa0   :  { %v620_v10 = vsel %vm333_vm2, %v2229_v59, %v2228_v0  ;;  %v773_v16 = vmul.f32 %v942_v1, %v1901_v22  ;;  %v578_v60 = vadd.f32 %v563_v47, %v513_v17  ;;  %v399_v45 = vadd.f32 %v384_v18, %v302_v12  ;;  %v944_v4 = vpop.eup %943 }
  0xa1   :  { %v442_v21 = vmul.f32 %v1303_v48, %v2230_v40  ;;  %v767_v43 = vmul.f32 %v1854_v57, %v1753_v37  ;;  %v640_v20 = vadd.f32 %v626_v58, %v576_v14  ;;  %v637_v19 = vadd.f32 %v620_v10, %v573_v2  ;;  %v2232_v2 = vld [vmem:[#allocation23_spill] sm:$0xff]  ;;  %v2238_v40 = vld [vmem:[#allocation44_spill] sm:$0xff] }
  0xa2   :  { %v684_v46 = vmul.f32 %v1531_v35, %v2231_v53  ;;  %v577_v39 = vadd.f32 %v564_v41, %v512_v52  ;;  %v628_v22 = vsel %vm333_vm2, %v625_v30, %v627_v55  ;;  %vm727_vm15 = vcmp.eq.f32.partialorder %v1943_v28, inf }
  0xa3   :  { %v730_v48 = vand.u32 2147483648, %v1943_v28  ;;  %v778_v47 = vsub.f32 2.0, %v771_v26  ;;  %v775_v6 = vsub.f32 2.0, %v768_v15  ;;  %v726_v13 = vmul.f32 %v944_v4, %v1943_v28 }
  0xa4   :  { %vm729_vm3 = vcmp.eq.f32.partialorder %v1943_v28, 0.0  ;;  %v780_v37 = vsub.f32 2.0, %v773_v16  ;;  %v642_v38 = vadd.f32 %v627_v55, %v578_v60  ;;  %v689_v17 = vmul.f32 %v1531_v35, %v1740_v27  ;;  %v827_v16 = vpop.permute.xlu0 %826  ;;  %v2237_v60 = vld [vmem:[#allocation43_spill] sm:$0xff] }
  0xa5   :  { %v449_v54 = vadd.f32 %v442_v21, %v399_v45  ;;  %v776_v12 = vsub.f32 2.0, %v1969_v56  ;;  %v694_v30 = vsub.f32 %v640_v20, %v1979_v51  ;;  %v728_v14 = vsel %vm727_vm15, %v1943_v28, %v726_v13 }
  0xa6   :  { %v2233_v24 = vrot.slane %v2232_v2, 2  ;;  %v774_v49 = vsub.f32 2.0, %v767_v43  ;;  %v641_v18 = vadd.f32 %v628_v22, %v577_v39  ;;  %v688_v27 = vmul.f32 %v1531_v35, %v1823_v62  ;;  %v2235_v62 = vld [vmem:[#allocation27_spill] sm:$0xff] }
  0xa7   :  { %v731_v56 = vsel %vm729_vm3, %v730_v48, %v728_v14  ;;  %v785_v58 = vmul.f32 %v938_v63, %v778_v47  ;;  %v782_v50 = vmul.f32 %v940_v34, %v775_v6  ;;  %v691_v0 = vsub.f32 %v637_v19, %v684_v46  ;;  %v2241_v46 = vld [vmem:[#allocation21_spill] sm:$0xff]  ;;  %v2242_v39 = vld [vmem:[#allocation35_spill] sm:$0xff] }
  0xa8   :  { %v495_v32 = vsel %vm132_vm0, %v2233_v24, %v494_v42  ;;  %v756_v59 = vadd.f32 1e-08, %v731_v56  ;;  %v787_v51 = vmul.f32 %v942_v1, %v780_v37  ;;  %v696_v10 = vsub.f32 %v642_v38, %v689_v17  ;;  %v832_v25 = vpop.permute.xlu0 %831 }
  0xa9   :  { %v510_v55 = vadd.f32 %v495_v32, %v449_v54  ;;  %v946_v28 = vpop.eup %945  ;;  %v692_v42 = vsub.f32 %v1745_v5, %v2234_v36  ;;  %v690_v52 = vsub.f32 %v1784_v7, %v1749_v11  ;;  %v2236_v63 = vrot.slane %v2235_v62, 4 }
  0xaa   :  { %947 = vrcp.f32 %v756_v59  ;;  %v783_v1 = vmul.f32 %v1815_v8, %v776_v12  ;;  %v781_v26 = vmul.f32 %v1854_v57, %v774_v49  ;;  %v772_v15 = vmul.f32 %v946_v28, %v758_v9  ;;  %v2239_v9 = vld [vmem:[#allocation29_spill] sm:$0xff] }
  0xab   :  { %v560_v34 = vsel %vm236_vm1, %v2236_v63, %v559_v61  ;;  %v695_v41 = vsub.f32 %v641_v18, %v688_v27  ;;  %v792_v5 = vmul.f32 %v785_v58, %v2237_v60  ;;  %v799_v45 = vmul.f32 2.0, %v694_v30  ;;  %v837_v61 = vpop.permute.xlu1 %836 }
  0xac   :  { %v789_v11 = vmul.f32 %v782_v50, %v2238_v40  ;;  %v796_v7 = vmul.f32 2.0, %v691_v0  ;;  %v794_v29 = vmul.f32 %v787_v51, %v1790_v23  ;;  %v801_v21 = vmul.f32 2.0, %v696_v10 }
  0xad   :  { %v779_v43 = vsub.f32 2.0, %v772_v15  ;;  %v575_v20 = vadd.f32 %v560_v34, %v510_v55  ;;  %v797_v8 = vmul.f32 2.0, %v692_v42  ;;  %v795_v57 = vmul.f32 2.0, %v690_v52 }
  0xae   :  { %v2240_v19 = vrot.slane %v2239_v9, 6  ;;  %v790_v4 = vmul.f32 %v783_v1, %v2241_v46  ;;  %v788_v22 = vmul.f32 %v781_v26, %v2242_v39  ;;  %v800_v48 = vmul.f32 2.0, %v695_v41 }
  0xaf   :  { %v786_v23 = vmul.f32 %v946_v28, %v779_v43  ;;  %v806_v47 = vsub.f32 %v792_v5, %v799_v45  ;;  %v803_v6 = vsub.f32 %v789_v11, %v796_v7  ;;  %v808_v13 = vsub.f32 %v794_v29, %v801_v21  ;;  %v847_v14 = vpop.permute.xlu1 %846 }
  0xb0   :  { %v624_v53 = vsel %vm333_vm2, %v2240_v19, %v623_v44  ;;  %v686_v17 = vmul.f32 %v1531_v35, %v1876_v33  ;;  %v804_v54 = vsub.f32 %v790_v4, %v797_v8  ;;  %v802_v12 = vsub.f32 %v788_v22, %v795_v57  ;;  %v852_v35 = vpop.permute.xlu0 %851 }
  0xb1   :  { %v793_v37 = vmul.f32 %v786_v23, %v1861_v3  ;;  %v639_v38 = vadd.f32 %v624_v53, %v575_v20  ;;  %v813_v2 = vmul.f32 %v806_v47, %v785_v58  ;;  %v810_v24 = vmul.f32 %v803_v6, %v782_v50 }
  0xb2   :  { %v815_v32 = vmul.f32 %v808_v13, %v787_v51  ;;  %v816_v56 = vstv %s73_s15  ;;  %v811_v0 = vmul.f32 %v804_v54, %v783_v1  ;;  %v809_v3 = vmul.f32 %v802_v12, %v781_v26 }
  0xb3   :  { %v807_v44 = vsub.f32 %v793_v37, %v800_v48  ;;  %v693_v27 = vsub.f32 %v639_v38, %v686_v17  ;;  %v821_v28 = vadd.f32 %v816_v56, %v813_v2  ;;  %v818_v33 = vadd.f32 %v816_v56, %v810_v24  ;;  %v857_v62 = vpop.permute.xlu1 %856 }
  0xb4   :  { %v948_v30 = vpop.eup %947  ;;  %v823_v36 = vadd.f32 %v816_v56, %v815_v32  ;;  %v819_v63 = vadd.f32 %v816_v56, %v811_v0  ;;  %v817_v34 = vadd.f32 %v816_v56, %v809_v3  ;;  %vm866_vm0 = vcmask 523264   ;;  %v842_v45 = vpop.permute.xlu0 %841 }
  0xb5   :  { %v814_v49 = vmul.f32 %v807_v44, %v786_v23  ;;  %v770_v18 = vmul.f32 %v948_v30, %v756_v59  ;;  %v798_v52 = vmul.f32 2.0, %v693_v27  ;;  %v863_v51 = vmul.f32 %v847_v14, %v821_v28 }
  0xb6   :  { %v860_v59 = vmul.f32 %v832_v25, %v818_v33  ;;  %v865_v15 = vmul.f32 %v857_v62, %v823_v36  ;;  %vm875_vm1 = vcmask 517120   ;;  %v861_v1 = vmul.f32 %v837_v61, %v819_v63 }
  0xb7   :  { %v822_v10 = vadd.f32 %v816_v56, %v814_v49  ;;  %v777_v55 = vsub.f32 2.0, %v770_v18  ;;  %v859_v26 = vmul.f32 %v827_v16, %v817_v34  ;;  %v871_v40 = vsel %vm866_vm0, %v863_v51, inf }
  0xb8   :  { %v868_v11 = vsel %vm866_vm0, %v860_v59, inf  ;;  %v876_v7 = vsel %vm875_vm1, %v865_v15, inf  ;;  %vm888_vm2 = vcmask 516096  }
  0xb9   :  { %v784_v42 = vmul.f32 %v948_v30, %v777_v55  ;;  %v864_v58 = vmul.f32 %v852_v35, %v822_v10  ;;  %v867_v43 = vsel %vm866_vm0, %v859_v26, inf }
  0xba   :  { %v872_v8 = vmin.f32 %v867_v43, %v871_v40 }
  0xbb   :  { %v791_v50 = vmul.f32 %v784_v42, %v1918_v31  ;;  %v873_v60 = vsel %vm866_vm0, %v864_v58, inf  ;;  %v869_v31 = vsel %vm866_vm0, %v861_v1, inf }
  0xbc   :  { %v874_v21 = vmin.f32 %v868_v11, %v873_v60  ;;  %v877_v57 = vmin.f32 %v869_v31, %v876_v7 }
  0xbd   :  { %v805_v41 = vsub.f32 %v791_v50, %v798_v52 }
  0xbe   :  { %v878_v61 = vmin.f32 %v872_v8, %v874_v21 }
  0xbf   :  { %v812_v5 = vmul.f32 %v805_v41, %v784_v42 }
  0xc1   :  { %v820_v29 = vadd.f32 %v816_v56, %v812_v5 }
  0xc3   :  { %v862_v20 = vmul.f32 %v842_v45, %v820_v29 }
  0xc5   :  { %v870_v16 = vsel %vm866_vm0, %v862_v20, inf }
  0xc6   :  { %v879_v9 = vmin.f32 %v877_v57, %v870_v16 }
  0xc8   :  { %v880_v19 = vmin.f32 %v878_v61, %v879_v9 }
  0xca   :  { %v881_v53 = vrot.slane %v880_v19, 4 }
  0xcc   :  { %v882_v46 = vmin.f32 %v880_v19, %v881_v53 }
  0xce   :  { %v883_v4 = vrot.slane %v882_v46, 2 }
  0xd0   :  { %v884_v39 = vmin.f32 %v882_v46, %v883_v4 }
  0xd2   :  { %v885_v22 = vrot.slane %v884_v39, 1 }
  0xd4   :  { %v886_v23 = vmin.f32 %v884_v39, %v885_v22 }
  0xd6   :  { %v887_v48 = vmax.f32 %v886_v23, 0.0 }
  0xd8   :  { %889 = vst.msk [vmem:[#allocation7] sm:$0x1] %vm888_vm2, %v887_v48 }
  0xd9   :  { %994 = shalt.err (!%p991_p3)
}
  0xda   :  { %s995_s21 = scalar_lea.hbm %s2079_s3, 16 }
  0xdb   :  { %p996_p4 = scmp.ne.s32.totalorder %s2079_s3, %s995_s21  ;;  %p999_p5 = scmp.lt.u32.totalorder %s995_s21, %s2079_s3 }
  0xdd   :  { %p1001_p6 = pnand %p999_p5, %p996_p4 }
  0xdf   :  { %1004 = shalt.err (!%p1001_p6)
}
  0xe0   :  { %899 = dma.vmem_to_hbm [thread:$0]  %s897_s16, 16, %s2079_s3, [#allocation4]  }
  0xe1   :  { %1009 = dma.done.wait [#allocation4], 16  }
  0xe2   :  { %1010 = vsyncadd [#allocation4], 4294967280 }
  0xe3   :  { %903 = vsyncpa [#allocation3], 1 }
  0xe4   :  { %904 = vsyncpa [#allocation4], 1 }
  0xe5   :  { %905 = vsyncpa [#allocation5], 1 }

</bundles_post_ra>
